<compile_context>
chip_gen: v7x
topology: tpu7x:2x2x1
jax: 0.10.0
libtpu: 0.0.40
codegen_flags: <defaults>
</compile_context>

<pallas_src>
import jax
import jax.numpy as jnp
from jax import lax
from jax.experimental import pallas as pl
from jax.experimental.pallas import tpu as pltpu


# --------------------------------------------------------------------------
# Fused Pallas kernel: the whole GINConv stack.
# grid = (num_layers, num_edge_blocks); both axes sequential ("arbitrary"):
# layer axis carries h in VMEM scratch, edge axis is a reduction into agg_sc.
# --------------------------------------------------------------------------
def _gnn_stack_kernel(x0_ref, ea_ref, src_ref, dst_ref,
                      we_ref, be_ref, w1_ref, b1_ref, w2_ref, b2_ref,
                      out_ref, h_sc, agg_sc):
    f32, bf16 = jnp.float32, jnp.bfloat16
    layer = pl.program_id(0)
    eblk_i = pl.program_id(1)
    n_layers = pl.num_programs(0)
    n_eblk = pl.num_programs(1)
    N, H = h_sc.shape
    Eblk = src_ref.shape[1]

    # ---- init node features (first grid step) / per-layer aggregation acc
    @pl.when(jnp.logical_and(layer == 0, eblk_i == 0))
    def _():
        h_sc[...] = x0_ref[...]

    @pl.when(eblk_i == 0)
    def _():
        agg_sc[...] = jnp.zeros_like(agg_sc)

    # ---- one-hot node-vs-edge masks for this edge block, built in bf16
    #      (exact 0/1, half the vreg/VMEM footprint, 2x MXU rate vs f32).
    #      Padded edges carry index N (out of range) -> all-zero column.
    node_iota = lax.broadcasted_iota(jnp.int32, (N, Eblk), 0)
    gather_m = (node_iota == dst_ref[...]).astype(bf16)     # (N, Eblk)  dst one-hot
    scatter_m = (node_iota == src_ref[...]).astype(bf16)    # (N, Eblk)  src one-hot

    # ---- edge encoder: Linear(Fe -> H) for this edge block
    e_emb = jnp.dot(ea_ref[...], we_ref[...],
                    preferred_element_type=f32) + be_ref[...]           # (Eblk, H)

    # ---- gather h[dst]: contract the mask over the node axis (transposed LHS)
    h_bf = h_sc[...].astype(bf16)
    xg = lax.dot_general(gather_m, h_bf, (((0,), (0,)), ((), ())),
                         preferred_element_type=f32)                    # (Eblk, H)

    # ---- fused concat + scatter-add:  agg += scatter_m @ [x[dst] | e_emb]
    feat = jnp.concatenate([xg, e_emb], axis=1).astype(bf16)            # (Eblk, 2H)
    agg_sc[...] += jnp.dot(scatter_m, feat, preferred_element_type=f32)

    # ---- end of the edge reduction: MLP (BatchNorm folded into W1/b1 on host)
    @pl.when(eblk_i == n_eblk - 1)
    def _():
        z = jnp.dot(agg_sc[...], w1_ref[...],
                    preferred_element_type=f32) + b1_ref[...]           # (N, 2H)
        z = jnp.maximum(z, 0.0)
        h_new = jnp.dot(z, w2_ref[...],
                        preferred_element_type=f32) + b2_ref[...]       # (N, H)
        # inter-layer F.relu (skipped after last layer); dropout = id in eval
        h_new = jnp.where(layer < n_layers - 1, jnp.maximum(h_new, 0.0), h_new)
        h_sc[...] = h_new
        out_ref[...] = h_new        # single output block -> flushed once at end


# --------------------------------------------------------------------------
# Host-side parameter folding and the pallas_call wrapper
# --------------------------------------------------------------------------
def _fold_layer_params(p, H):
    """Fold eval-mode BN into W1/b1 and lift layer-0's W1 to the concat form."""
    We, be, W1, b1, gamma, beta, rm, rv, W2, b2 = p
    if W1.shape[0] == H:                       # non-concat layer:
        W1 = jnp.concatenate([W1, W1], axis=0)  # [xg|e] @ [[W];[W]] == (xg+e) @ W
    scale = gamma / jnp.sqrt(rv + 1e-5)        # (1, 2H)
    return We, be, W1 * scale, (b1 - rm) * scale + beta, W2, b2


def gin_stack_pallas(x0, ea, src_row, dst_row, stacked_params, *, edge_block):
    N, H = x0.shape
    Epad, Fe = ea.shape
    L = stacked_params[0].shape[0]
    n_eblk = Epad // edge_block

    wmap = lambda l, e: (l, 0, 0)
    in_specs = [
        pl.BlockSpec((N, H), lambda l, e: (0, 0)),             # x0 (resident)
        pl.BlockSpec((edge_block, Fe), lambda l, e: (e, 0)),   # edge attrs
        pl.BlockSpec((1, edge_block), lambda l, e: (0, e)),    # src (scatter idx)
        pl.BlockSpec((1, edge_block), lambda l, e: (0, e)),    # dst (gather idx)
        pl.BlockSpec((None, Fe, H), wmap),                     # We  (per layer)
        pl.BlockSpec((None, 1, H), wmap),                      # be
        pl.BlockSpec((None, 2 * H, 2 * H), wmap),              # W1  (BN folded)
        pl.BlockSpec((None, 1, 2 * H), wmap),                  # b1  (BN folded)
        pl.BlockSpec((None, 2 * H, H), wmap),                  # W2
        pl.BlockSpec((None, 1, H), wmap),                      # b2
    ]
    flops = L * (2 * Epad * Fe * H          # edge encoder
                 + 2 * N * Epad * H         # gather matmul
                 + 4 * N * Epad * H         # scatter matmul (2H wide)
                 + 8 * N * H * H            # W1
                 + 4 * N * H * H)           # W2
    bytes_accessed = 4 * (2 * N * H + Epad * Fe + 2 * Epad
                          + L * (Fe * H + 6 * H * H + 5 * H))
    return pl.pallas_call(
        _gnn_stack_kernel,
        grid=(L, n_eblk),
        in_specs=in_specs,
        out_specs=pl.BlockSpec((N, H), lambda l, e: (0, 0)),
        out_shape=jax.ShapeDtypeStruct((N, H), jnp.float32),
        scratch_shapes=[pltpu.VMEM((N, H), jnp.float32),        # resident h
                        pltpu.VMEM((N, 2 * H), jnp.float32)],   # aggregation acc
        compiler_params=pltpu.CompilerParams(
            dimension_semantics=("arbitrary", "arbitrary"),
            vmem_limit_bytes=32 * 1024 * 1024),
        cost_estimate=pl.CostEstimate(flops=flops, transcendentals=0,
                                      bytes_accessed=bytes_accessed),
    )(x0, ea, src_row, dst_row, *stacked_params)


def gnn_forward(x_int, edge_index, edge_attr, params, *, num_layers,
                self_loop_index, self_loop_type, edge_block=128):
    assert edge_block % 128 == 0
    assert len(params["layers"]) == num_layers
    # atom / chirality embedding lookups (plain JAX gather)
    x0 = params["atom_emb"][x_int[:, 0]] + params["chir_emb"][x_int[:, 1]]
    N, H = x0.shape
    Fe = edge_attr.shape[1]

    # add_self_loops + constant self-loop edge attribute (identical every layer)
    loops = jnp.arange(N, dtype=edge_index.dtype)
    ei = jnp.concatenate([edge_index, jnp.stack([loops, loops])], axis=1)
    sl_attr = jnp.zeros((N, Fe), edge_attr.dtype)
    sl_attr = sl_attr.at[:, self_loop_index].set(self_loop_type)
    ea = jnp.concatenate([edge_attr, sl_attr], axis=0)

    # pad edge arrays to a multiple of edge_block; padded edges get index N
    # (out of range) so their one-hot columns are all zero -> no contribution.
    Etot = ea.shape[0]
    Epad = ((Etot + edge_block - 1) // edge_block) * edge_block
    pad = Epad - Etot
    src_row = jnp.pad(ei[0].astype(jnp.int32), (0, pad), constant_values=N)[None, :]
    dst_row = jnp.pad(ei[1].astype(jnp.int32), (0, pad), constant_values=N)[None, :]
    ea_p = jnp.pad(ea.astype(jnp.float32), ((0, pad), (0, 0)))

    # fold eval-mode BN into W1/b1, lift layer 0 to concat form, stack per layer
    folded = [_fold_layer_params(p, H) for p in params["layers"]]
    stacked = tuple(jnp.stack(ws, axis=0) for ws in zip(*folded))

    # rough VMEM sanity check: resident node tensors + one double-buffered edge
    # block must fit comfortably under the scoped limit.
    vmem_est = (4 * N * (4 * H) + 4 * N * edge_block
                + 2 * 4 * edge_block * (Fe + 2))
    assert vmem_est < 24 * 1024 * 1024, "graph too large: tile the node dim too"

    return gin_stack_pallas(x0, ea_p, src_row, dst_row, stacked,
                            edge_block=edge_block)


# --------------------------------------------------------------------------
# Pure-JAX reference (original semantics: explicit BN, split concat handling).
# The only kernel behaviour it emulates is the bf16 rounding of the gather /
# scatter MXU operands, so a tight tolerance remains meaningful.
# --------------------------------------------------------------------------
def _gin_ref(x, ea, src, dst, p, concat, relu_out):
    We, be, W1, b1, g, beta, rm, rv, W2, b2 = p
    N = x.shape[0]
    e_emb = ea @ We + be
    xg = x[dst].astype(jnp.bfloat16).astype(jnp.float32)
    e_b = e_emb.astype(jnp.bfloat16).astype(jnp.float32)
    h = jnp.concatenate([xg, e_b], axis=1) if concat else xg + e_b
    hagg = jnp.zeros((N, h.shape[1]), jnp.float32).at[src].add(h)
    z = hagg @ W1 + b1
    z = (z - rm) * (g / jnp.sqrt(rv + 1e-5)) + beta
    z = jnp.maximum(z, 0.0)
    out = z @ W2 + b2
    return jnp.maximum(out, 0.0) if relu_out else out


def gnn_ref(x_int, edge_index, edge_attr, params, *,
            num_layers, self_loop_index, self_loop_type):
    x = params["atom_emb"][x_int[:, 0]] + params["chir_emb"][x_int[:, 1]]
    N = x.shape[0]
    loops = jnp.arange(N, dtype=edge_index.dtype)
    ei = jnp.concatenate([edge_index, jnp.stack([loops, loops])], axis=1)
    sl_attr = jnp.zeros((N, edge_attr.shape[1]), edge_attr.dtype)
    sl_attr = sl_attr.at[:, self_loop_index].set(self_loop_type)
    ea = jnp.concatenate([edge_attr, sl_attr], axis=0)
    h = x
    for i in range(num_layers):
        h = _gin_ref(h, ea, ei[0], ei[1], params["layers"][i],
                     i != 0, i != num_layers - 1)
    return h


# --------------------------------------------------------------------------
# Parameter init (deterministic, PyTorch shapes)
# --------------------------------------------------------------------------
def init_params(key, *, num_layers, hidden, edge_encode,
                num_atom_type, num_chirality_tag):
    H, Fe = hidden, edge_encode
    keys = jax.random.split(key, 2 + num_layers)
    params = {
        "atom_emb": 0.1 * jax.random.normal(keys[0], (num_atom_type, H), jnp.float32),
        "chir_emb": 0.1 * jax.random.normal(keys[1], (num_chirality_tag, H), jnp.float32),
        "layers": [],
    }
    for i in range(num_layers):
        in_feat = H if i == 0 else 2 * H
        k = jax.random.split(keys[2 + i], 5)
        We = jax.random.normal(k[0], (Fe, H), jnp.float32) / jnp.sqrt(Fe)
        be = 0.01 * jax.random.normal(k[1], (1, H), jnp.float32)
        W1 = jax.random.normal(k[2], (in_feat, 2 * H), jnp.float32) / jnp.sqrt(in_feat)
        b1 = 0.01 * jax.random.normal(k[3], (1, 2 * H), jnp.float32)
        gamma = jnp.ones((1, 2 * H), jnp.float32)
        beta = jnp.zeros((1, 2 * H), jnp.float32)
        rm = jnp.zeros((1, 2 * H), jnp.float32)
        rv = jnp.ones((1, 2 * H), jnp.float32)
        W2 = jax.random.normal(k[4], (2 * H, H), jnp.float32) / jnp.sqrt(2 * H)
        b2 = jnp.zeros((1, H), jnp.float32)
        params["layers"].append((We, be, W1, b1, gamma, beta, rm, rv, W2, b2))
    return params


# --------------------------------------------------------------------------
if __name__ == "__main__":
    # small but non-trivial: 3 layers, 2 edge blocks of 128 after padding
    N, E, H, Fe = 64, 192, 32, 8
    num_layers = 3
    num_atom_type, num_chirality_tag = 5, 3
    self_loop_index, self_loop_type = 0, 1.0

    key = jax.random.PRNGKey(0)
    k1, k2, k3, k4, kp = jax.random.split(key, 5)
    x_int = jnp.stack([jax.random.randint(k1, (N,), 0, num_atom_type),
                       jax.random.randint(k2, (N,), 0, num_chirality_tag)],
                      axis=1).astype(jnp.int32)                    # (N, 2)
    edge_index = jax.random.randint(k3, (2, E), 0, N).astype(jnp.int32)
    edge_attr = jax.random.normal(k4, (E, Fe), jnp.float32)

    params = init_params(kp, num_layers=num_layers, hidden=H, edge_encode=Fe,
                         num_atom_type=num_atom_type,
                         num_chirality_tag=num_chirality_tag)

    out = gnn_forward(x_int, edge_index, edge_attr, params,
                      num_layers=num_layers,
                      self_loop_index=self_loop_index,
                      self_loop_type=self_loop_type,
                      edge_block=128)
    out = jax.block_until_ready(out)

    ref = gnn_ref(x_int, edge_index, edge_attr, params,
                  num_layers=num_layers,
                  self_loop_index=self_loop_index,
                  self_loop_type=self_loop_type)
    ref = jax.block_until_ready(ref)

    assert out.shape == (N, H) and out.dtype == jnp.float32
    max_err = float(jnp.max(jnp.abs(out - ref)))
    assert jnp.allclose(out, ref, atol=1e-2, rtol=2e-2), (
        f"max abs err = {max_err}")
    print("KERNEL_OK")
</pallas_src>

<mosaic_0001>
module attributes {stable_mosaic.version = 11 : i64} {
  func.func @_gnn_stack_kernel(%arg0: i32, %arg1: i32, %arg2: memref<64x32xf32, #tpu.memory_space<vmem>>, %arg3: memref<128x8xf32, #tpu.memory_space<vmem>>, %arg4: memref<1x128xi32, #tpu.memory_space<vmem>>, %arg5: memref<1x128xi32, #tpu.memory_space<vmem>>, %arg6: memref<1x8x32xf32, #tpu.memory_space<vmem>>, %arg7: memref<1x1x32xf32, #tpu.memory_space<vmem>>, %arg8: memref<1x64x64xf32, #tpu.memory_space<vmem>>, %arg9: memref<1x1x64xf32, #tpu.memory_space<vmem>>, %arg10: memref<1x64x32xf32, #tpu.memory_space<vmem>>, %arg11: memref<1x1x32xf32, #tpu.memory_space<vmem>>, %arg12: memref<64x32xf32, #tpu.memory_space<vmem>>, %arg13: memref<64x32xf32, #tpu.memory_space<vmem>>, %arg14: memref<64x64xf32, #tpu.memory_space<vmem>>) attributes {dimension_semantics = [#tpu.dimension_semantics<arbitrary>, #tpu.dimension_semantics<arbitrary>], iteration_bounds = array<i64: 3, 2>, scalar_prefetch = 0 : i64, scratch_operands = 2 : i64, tpu.core_type = #tpu.core_type<tc>, window_params = [{pipeline_mode = #tpu.pipeline_mode<synchronous>, transform_indices = @transform_0, window_bounds = array<i64: 64, 32>}, {transform_indices = @transform_1, window_bounds = array<i64: 128, 8>}, {transform_indices = @transform_2, window_bounds = array<i64: 1, 128>}, {transform_indices = @transform_3, window_bounds = array<i64: 1, 128>}, {transform_indices = @transform_4, window_bounds = array<i64: 1, 8, 32>}, {transform_indices = @transform_5, window_bounds = array<i64: 1, 1, 32>}, {transform_indices = @transform_6, window_bounds = array<i64: 1, 64, 64>}, {transform_indices = @transform_7, window_bounds = array<i64: 1, 1, 64>}, {transform_indices = @transform_8, window_bounds = array<i64: 1, 64, 32>}, {transform_indices = @transform_9, window_bounds = array<i64: 1, 1, 32>}, {pipeline_mode = #tpu.pipeline_mode<synchronous>, transform_indices = @transform_10, window_bounds = array<i64: 64, 32>}]} {
    %c0_i32 = arith.constant 0 : i32
    %0 = arith.cmpi eq, %arg0, %c0_i32 : i32
    %c0_i32_0 = arith.constant 0 : i32
    %1 = arith.cmpi eq, %arg1, %c0_i32_0 : i32
    %2 = arith.andi %0, %1 : i1
    %3 = arith.extui %2 : i1 to i32
    %c0_i32_1 = arith.constant 0 : i32
    %4 = arith.cmpi ne, %3, %c0_i32_1 : i32
    scf.if %4 {
      %c0_24 = arith.constant 0 : index
      %c0_25 = arith.constant 0 : index
      %41 = vector.load %arg2[%c0_24, %c0_25] : memref<64x32xf32, #tpu.memory_space<vmem>>, vector<64x32xf32>
      %c0_26 = arith.constant 0 : index
      %c0_27 = arith.constant 0 : index
      %42 = vector.load %arg13[%c0_26, %c0_27] : memref<64x32xf32, #tpu.memory_space<vmem>>, vector<64x32xf32>
      tpu.vector_store %arg13[%c0_26, %c0_27], %41 {strides = array<i32>} : memref<64x32xf32, #tpu.memory_space<vmem>>, vector<64x32xf32>,
    } else {
    }
    %c0_i32_2 = arith.constant 0 : i32
    %5 = arith.cmpi eq, %arg1, %c0_i32_2 : i32
    %6 = arith.extui %5 : i1 to i32
    %c0_i32_3 = arith.constant 0 : i32
    %7 = arith.cmpi ne, %6, %c0_i32_3 : i32
    scf.if %7 {
      %cst_24 = arith.constant 0.000000e+00 : f32
      %41 = vector.broadcast %cst_24 : f32 to vector<64x64xf32>
      %c0_25 = arith.constant 0 : index
      %c0_26 = arith.constant 0 : index
      %42 = vector.load %arg14[%c0_25, %c0_26] : memref<64x64xf32, #tpu.memory_space<vmem>>, vector<64x64xf32>
      tpu.vector_store %arg14[%c0_25, %c0_26], %41 {strides = array<i32>} : memref<64x64xf32, #tpu.memory_space<vmem>>, vector<64x64xf32>,
    } else {
    }
    %8 = tpu.iota {dimensions = array<i32: 0>} : vector<64x128xi32>
    %c0 = arith.constant 0 : index
    %c0_4 = arith.constant 0 : index
    %9 = vector.load %arg5[%c0, %c0_4] : memref<1x128xi32, #tpu.memory_space<vmem>>, vector<1x128xi32>
    %10 = vector.broadcast %9 : vector<1x128xi32> to vector<64x128xi32>
    %11 = arith.cmpi eq, %8, %10 : vector<64x128xi32>
    %12 = arith.extui %11 : vector<64x128xi1> to vector<64x128xi32>
    %13 = arith.sitofp %12 : vector<64x128xi32> to vector<64x128xf32>
    %14 = arith.truncf %13 : vector<64x128xf32> to vector<64x128xbf16>
    %c0_5 = arith.constant 0 : index
    %c0_6 = arith.constant 0 : index
    %15 = vector.load %arg4[%c0_5, %c0_6] : memref<1x128xi32, #tpu.memory_space<vmem>>, vector<1x128xi32>
    %16 = vector.broadcast %15 : vector<1x128xi32> to vector<64x128xi32>
    %17 = arith.cmpi eq, %8, %16 : vector<64x128xi32>
    %18 = arith.extui %17 : vector<64x128xi1> to vector<64x128xi32>
    %19 = arith.sitofp %18 : vector<64x128xi32> to vector<64x128xf32>
    %20 = arith.truncf %19 : vector<64x128xf32> to vector<64x128xbf16>
    %c0_7 = arith.constant 0 : index
    %c0_8 = arith.constant 0 : index
    %21 = vector.load %arg3[%c0_7, %c0_8] : memref<128x8xf32, #tpu.memory_space<vmem>>, vector<128x8xf32>
    %c0_9 = arith.constant 0 : index
    %c0_10 = arith.constant 0 : index
    %c0_11 = arith.constant 0 : index
    %22 = vector.load %arg6[%c0_9, %c0_10, %c0_11] : memref<1x8x32xf32, #tpu.memory_space<vmem>>, vector<1x8x32xf32>
    %23 = vector.shape_cast %22 : vector<1x8x32xf32> to vector<8x32xf32>
    %cst = arith.constant dense<0.000000e+00> : vector<128x32xf32>
    %24 = tpu.matmul %21, %23, %cst {dimension_numbers = #tpu.dot_dimension_numbers<[1], [0], [0], [1], [0, 0, 1, 1], [], []>} : vector<128x8xf32>, vector<8x32xf32>, vector<128x32xf32> -> vector<128x32xf32>
    %c0_12 = arith.constant 0 : index
    %c0_13 = arith.constant 0 : index
    %c0_14 = arith.constant 0 : index
    %25 = vector.load %arg7[%c0_12, %c0_13, %c0_14] : memref<1x1x32xf32, #tpu.memory_space<vmem>>, vector<1x1x32xf32>
    %26 = vector.shape_cast %25 : vector<1x1x32xf32> to vector<1x32xf32>
    %27 = vector.broadcast %26 : vector<1x32xf32> to vector<128x32xf32>
    %28 = arith.addf %24, %27 : vector<128x32xf32>
    %c0_15 = arith.constant 0 : index
    %c0_16 = arith.constant 0 : index
    %29 = vector.load %arg13[%c0_15, %c0_16] : memref<64x32xf32, #tpu.memory_space<vmem>>, vector<64x32xf32>
    %30 = arith.truncf %29 : vector<64x32xf32> to vector<64x32xbf16>
    %cst_17 = arith.constant dense<0.000000e+00> : vector<128x32xf32>
    %31 = tpu.matmul %14, %30, %cst_17 {dimension_numbers = #tpu.dot_dimension_numbers<[0], [0], [1], [1], [0, 1, 1, 1], [], []>} : vector<64x128xbf16>, vector<64x32xbf16>, vector<128x32xf32> -> vector<128x32xf32>
    %32 = tpu.concatenate %31, %28 in 1 : vector<128x32xf32>, vector<128x32xf32> -> vector<128x64xf32>
    %33 = arith.truncf %32 : vector<128x64xf32> to vector<128x64xbf16>
    %c0_18 = arith.constant 0 : index
    %c0_19 = arith.constant 0 : index
    %34 = vector.load %arg14[%c0_18, %c0_19] : memref<64x64xf32, #tpu.memory_space<vmem>>, vector<64x64xf32>
    %cst_20 = arith.constant dense<0.000000e+00> : vector<64x64xf32>
    %35 = tpu.matmul %20, %33, %cst_20 {dimension_numbers = #tpu.dot_dimension_numbers<[1], [0], [0], [1], [0, 0, 1, 1], [], []>} : vector<64x128xbf16>, vector<128x64xbf16>, vector<64x64xf32> -> vector<64x64xf32>
    %36 = arith.addf %34, %35 : vector<64x64xf32>
    %c0_21 = arith.constant 0 : index
    %c0_22 = arith.constant 0 : index
    %37 = vector.load %arg14[%c0_21, %c0_22] : memref<64x64xf32, #tpu.memory_space<vmem>>, vector<64x64xf32>
    tpu.vector_store %arg14[%c0_21, %c0_22], %36 {strides = array<i32>} : memref<64x64xf32, #tpu.memory_space<vmem>>, vector<64x64xf32>,
    %c1_i32 = arith.constant 1 : i32
    %38 = arith.cmpi eq, %arg1, %c1_i32 : i32
    %39 = arith.extui %38 : i1 to i32
    %c0_i32_23 = arith.constant 0 : i32
    %40 = arith.cmpi ne, %39, %c0_i32_23 : i32
    scf.if %40 {
      %c0_24 = arith.constant 0 : index
      %c0_25 = arith.constant 0 : index
      %41 = vector.load %arg14[%c0_24, %c0_25] : memref<64x64xf32, #tpu.memory_space<vmem>>, vector<64x64xf32>
      %c0_26 = arith.constant 0 : index
      %c0_27 = arith.constant 0 : index
      %c0_28 = arith.constant 0 : index
      %42 = vector.load %arg8[%c0_26, %c0_27, %c0_28] : memref<1x64x64xf32, #tpu.memory_space<vmem>>, vector<1x64x64xf32>
      %43 = vector.shape_cast %42 : vector<1x64x64xf32> to vector<64x64xf32>
      %cst_29 = arith.constant dense<0.000000e+00> : vector<64x64xf32>
      %44 = tpu.matmul %41, %43, %cst_29 {dimension_numbers = #tpu.dot_dimension_numbers<[1], [0], [0], [1], [0, 0, 1, 1], [], []>} : vector<64x64xf32>, vector<64x64xf32>, vector<64x64xf32> -> vector<64x64xf32>
      %c0_30 = arith.constant 0 : index
      %c0_31 = arith.constant 0 : index
      %c0_32 = arith.constant 0 : index
      %45 = vector.load %arg9[%c0_30, %c0_31, %c0_32] : memref<1x1x64xf32, #tpu.memory_space<vmem>>, vector<1x1x64xf32>
      %46 = vector.shape_cast %45 : vector<1x1x64xf32> to vector<1x64xf32>
      %47 = vector.broadcast %46 : vector<1x64xf32> to vector<64x64xf32>
      %48 = arith.addf %44, %47 : vector<64x64xf32>
      %cst_33 = arith.constant 0.000000e+00 : f32
      %49 = vector.broadcast %cst_33 : f32 to vector<64x64xf32>
      %50 = arith.maximumf %48, %49 : vector<64x64xf32>
      %c0_34 = arith.constant 0 : index
      %c0_35 = arith.constant 0 : index
      %c0_36 = arith.constant 0 : index
      %51 = vector.load %arg10[%c0_34, %c0_35, %c0_36] : memref<1x64x32xf32, #tpu.memory_space<vmem>>, vector<1x64x32xf32>
      %52 = vector.shape_cast %51 : vector<1x64x32xf32> to vector<64x32xf32>
      %cst_37 = arith.constant dense<0.000000e+00> : vector<64x32xf32>
      %53 = tpu.matmul %50, %52, %cst_37 {dimension_numbers = #tpu.dot_dimension_numbers<[1], [0], [0], [1], [0, 0, 1, 1], [], []>} : vector<64x64xf32>, vector<64x32xf32>, vector<64x32xf32> -> vector<64x32xf32>
      %c0_38 = arith.constant 0 : index
      %c0_39 = arith.constant 0 : index
      %c0_40 = arith.constant 0 : index
      %54 = vector.load %arg11[%c0_38, %c0_39, %c0_40] : memref<1x1x32xf32, #tpu.memory_space<vmem>>, vector<1x1x32xf32>
      %55 = vector.shape_cast %54 : vector<1x1x32xf32> to vector<1x32xf32>
      %56 = vector.broadcast %55 : vector<1x32xf32> to vector<64x32xf32>
      %57 = arith.addf %53, %56 : vector<64x32xf32>
      %c2_i32 = arith.constant 2 : i32
      %58 = arith.cmpi slt, %arg0, %c2_i32 : i32
      %cst_41 = arith.constant 0.000000e+00 : f32
      %59 = vector.broadcast %cst_41 : f32 to vector<64x32xf32>
      %60 = arith.maximumf %57, %59 : vector<64x32xf32>
      %61 = arith.select %58, %60, %57 : vector<64x32xf32>
      %c0_42 = arith.constant 0 : index
      %c0_43 = arith.constant 0 : index
      %62 = vector.load %arg13[%c0_42, %c0_43] : memref<64x32xf32, #tpu.memory_space<vmem>>, vector<64x32xf32>
      tpu.vector_store %arg13[%c0_42, %c0_43], %61 {strides = array<i32>} : memref<64x32xf32, #tpu.memory_space<vmem>>, vector<64x32xf32>,
      %c0_44 = arith.constant 0 : index
      %c0_45 = arith.constant 0 : index
      %63 = vector.load %arg12[%c0_44, %c0_45] : memref<64x32xf32, #tpu.memory_space<vmem>>, vector<64x32xf32>
      tpu.vector_store %arg12[%c0_44, %c0_45], %61 {strides = array<i32>} : memref<64x32xf32, #tpu.memory_space<vmem>>, vector<64x32xf32>,
    } else {
    }
    return
  }
  func.func @transform_0(%arg0: i32, %arg1: i32) -> (i32, i32) {
    %c0_i32 = arith.constant 0 : i32
    %c0_i32_0 = arith.constant 0 : i32
    %c0_i32_1 = arith.constant 0 : i32
    return %c0_i32, %c0_i32_0 : i32, i32
  }
  func.func @transform_1(%arg0: i32, %arg1: i32) -> (i32, i32) {
    %c0_i32 = arith.constant 0 : i32
    %c0_i32_0 = arith.constant 0 : i32
    return %arg1, %c0_i32 : i32, i32
  }
  func.func @transform_2(%arg0: i32, %arg1: i32) -> (i32, i32) {
    %c0_i32 = arith.constant 0 : i32
    %c0_i32_0 = arith.constant 0 : i32
    return %c0_i32, %arg1 : i32, i32
  }
  func.func @transform_3(%arg0: i32, %arg1: i32) -> (i32, i32) {
    %c0_i32 = arith.constant 0 : i32
    %c0_i32_0 = arith.constant 0 : i32
    return %c0_i32, %arg1 : i32, i32
  }
  func.func @transform_4(%arg0: i32, %arg1: i32) -> (i32, i32, i32) {
    %c0_i32 = arith.constant 0 : i32
    %c0_i32_0 = arith.constant 0 : i32
    %c0_i32_1 = arith.constant 0 : i32
    return %arg0, %c0_i32, %c0_i32_0 : i32, i32, i32
  }
  func.func @transform_5(%arg0: i32, %arg1: i32) -> (i32, i32, i32) {
    %c0_i32 = arith.constant 0 : i32
    %c0_i32_0 = arith.constant 0 : i32
    %c0_i32_1 = arith.constant 0 : i32
    return %arg0, %c0_i32, %c0_i32_0 : i32, i32, i32
  }
  func.func @transform_6(%arg0: i32, %arg1: i32) -> (i32, i32, i32) {
    %c0_i32 = arith.constant 0 : i32
    %c0_i32_0 = arith.constant 0 : i32
    %c0_i32_1 = arith.constant 0 : i32
    return %arg0, %c0_i32, %c0_i32_0 : i32, i32, i32
  }
  func.func @transform_7(%arg0: i32, %arg1: i32) -> (i32, i32, i32) {
    %c0_i32 = arith.constant 0 : i32
    %c0_i32_0 = arith.constant 0 : i32
    %c0_i32_1 = arith.constant 0 : i32
    return %arg0, %c0_i32, %c0_i32_0 : i32, i32, i32
  }
  func.func @transform_8(%arg0: i32, %arg1: i32) -> (i32, i32, i32) {
    %c0_i32 = arith.constant 0 : i32
    %c0_i32_0 = arith.constant 0 : i32
    %c0_i32_1 = arith.constant 0 : i32
    return %arg0, %c0_i32, %c0_i32_0 : i32, i32, i32
  }
  func.func @transform_9(%arg0: i32, %arg1: i32) -> (i32, i32, i32) {
    %c0_i32 = arith.constant 0 : i32
    %c0_i32_0 = arith.constant 0 : i32
    %c0_i32_1 = arith.constant 0 : i32
    return %arg0, %c0_i32, %c0_i32_0 : i32, i32, i32
  }
  func.func @transform_10(%arg0: i32, %arg1: i32) -> (i32, i32) {
    %c0_i32 = arith.constant 0 : i32
    %c0_i32_0 = arith.constant 0 : i32
    %c0_i32_1 = arith.constant 0 : i32
    return %c0_i32, %c0_i32_0 : i32, i32
  }
}

</mosaic_0001>

<bundles_post_ra>
// kernel: tpu_custom_call.1
= control target key start
LH: loop header
LB: loop body
LE: loop exit
PB: predicated region body
PF: predicated region fallthrough
CT: control target
= control target key end

     0   :  { %s2112_s13 = smov 0   ;;  %s2114_s14 = smov 0   ;;  %s2493_s0 = inlined_call_operand.vmem [shape: f32[64,32], index: 0, kind: input, shape index: {}]   ;;  %s2494_s1 = inlined_call_operand.vmem [shape: f32[256,8], index: 1, kind: input, shape index: {}]   ;;  %s2495_s2 = inlined_call_operand.vmem [shape: s32[1,256], index: 2, kind: input, shape index: {}]   ;;  %s2496_s3 = inlined_call_operand.vmem [shape: s32[1,256], index: 3, kind: input, shape index: {}]   ;;  %s2497_s4 = inlined_call_operand.vmem [shape: f32[3,8,32], index: 4, kind: input, shape index: {}]   ;;  %s2498_s5 = inlined_call_operand.vmem [shape: f32[3,1,32], index: 5, kind: input, shape index: {}]   ;;  %s2499_s6 = inlined_call_operand.vmem [shape: f32[3,64,64], index: 6, kind: input, shape index: {}]   ;;  %s2500_s7 = inlined_call_operand.vmem [shape: f32[3,1,64], index: 7, kind: input, shape index: {}]   ;;  %s2501_s8 = inlined_call_operand.vmem [shape: f32[3,64,32], index: 8, kind: input, shape index: {}]   ;;  %s2502_s9 = inlined_call_operand.vmem [shape: f32[3,1,32], index: 9, kind: input, shape index: {}]   ;;  %s2503_s10 = inlined_call_operand.vmem [shape: f32[64,32], index: 10, kind: output, shape index: {}]  }
   0x1   :  { %2507 = sst [smem:[#allocation9_spill]] %s2494_s1  ;;  %s2116_s15 = smov 0  }
   0x2   :  { %s2118_s16 = smov 0   ;;  %s2120_s17 = smov 0  }
   0x3 LB: > { %2508 = sst [smem:[#allocation4_spill]] %s2043_s15  ;;  %s29_s18 = sadd.s32 1, %s2043_s15  ;;  %s2051_s17 = sphi %s2120_s17, %s20_s17   ;;  %s2047_s16 = sphi %s2118_s16, %s2525_s16   ;;  %s2043_s15 = sphi %s2116_s15, %s2524_s15   ;;  %s2039_s14 = sphi %s2114_s14, %s2523_s14   ;;  %s2035_s13 = sphi %s2112_s13, %s2522_s13  }
   0x4   : > { %2509 = sst [smem:[#allocation5_spill]] %s2047_s16  ;;  %s32_s19 = sadd.s32 1, %s2047_s16 }
   0x5   : > { %2510 = sst [smem:[#allocation6_spill]] %s2051_s17  ;;  %p30_p0 = scmp.ge.s32.totalorder %s29_s18, 2 }
   0x6   : > { %p1610_p1 = scmp.ge.s32.totalorder %s2051_s17, 1  ;;  %p389_p2 = scmp.lt.s32.totalorder %s2051_s17, 7 }
   0x7   : > { %s2527_s18 = smov (%p30_p0, %s29_s18), 0  ;;  %s2529_s19 = smov (!%p30_p0, %s32_s19), %s2047_s16 }
   0x8   : > { %2511 = sst [smem:[#allocation7_spill]] %s2527_s18  ;;  %p390_p3 = pnand %p1610_p1, %p389_p2 }
   0x9   : > { %p34_p4 = scmp.ge.s32.totalorder %s2529_s19, 3  ;;  %s1611_s20 = sshll.u32 (!%p390_p3), %s2035_s13, 4 }
   0xa   : > { %393 = sbr.rel (%p390_p3) target bundleno = 1082 (0x43a), region = 60  ;;  %p457_p5 = scmp.lt.s32.totalorder (!%p390_p3), %s2035_s13, 1 }
   0xb   : > { %s2531_s19 = smov (%p34_p4, %s2529_s19), 0  ;;  %p452_p6 = scmp.lt.s32.totalorder (!%p390_p3), %s1611_s20, 31 }
   0xc   : > { %2512 = sst [smem:[#allocation8_spill]] %s2531_s19  ;;  %p463_p7 = scmp.lt.s32.totalorder (!%p390_p3), %s2039_s14, 2 }
   0xd   : > { %p487_p8 = scmp.eq.s32.totalorder (!%p390_p3), %s2039_s14, 0  ;;  %s2513_s1 = sld [smem:[#allocation9_spill]] (!%p390_p3) }
   0xe   : > { %p488_p9 = scmp.eq.s32.totalorder (!%p390_p3), %s2035_s13, 0 }
  0x10   : > { %p489_p10 = pnand (!%p390_p3), %p488_p9, %p487_p8 }
  0x11   : > { %s2150_s21 = scalar_select %p457_p5, %s2035_s13, 1 }
  0x12   : > { %s2533_s20 = smov (!%p452_p6, %s1611_s20), 31  ;;  %v493_v0 = vld [vmem:[%s2493_s0] sm:$0xff] (!%p489_p10)  ;;  %vm501_vm0 = vcmask (!%p489_p10), 261120   ;;  %v494_v1 = vld [vmem:[%s2493_s0 + $0x8] sm:$0xff] (!%p489_p10)  ;;  %v495_v2 = vld [vmem:[%s2493_s0 + $0x10] sm:$0xff] (!%p489_p10) }
  0x13   : > { %s1612_s28 = sshll.u32 %s2533_s20, 3  ;;  %502 = vst.msk [vmem:[#allocation2] sm:$0xff] (!%p489_p10), %vm501_vm0, %v493_v0  ;;  %503 = vst.msk [vmem:[#allocation2 + $0x8] sm:$0xff] (!%p489_p10), %vm501_vm0, %v494_v1  ;;  %v496_v3 = vld [vmem:[%s2493_s0 + $0x18] sm:$0xff] (!%p489_p10)  ;;  %v497_v4 = vld [vmem:[%s2493_s0 + $0x20] sm:$0xff] (!%p489_p10) }
  0x14   : > { %s2164_s11 = scalar_lea.vmem %s2513_s1, %s1612_s28  ;;  %492 = sbr.rel (%p489_p10) target bundleno = 27 (0x1b), region = 64  ;;  %504 = vst.msk [vmem:[#allocation2 + $0x10] sm:$0xff] (!%p489_p10), %vm501_vm0, %v495_v2  ;;  %v498_v5 = vld [vmem:[%s2493_s0 + $0x28] sm:$0xff] (!%p489_p10)  ;;  %505 = vst.msk [vmem:[#allocation2 + $0x18] sm:$0xff] (!%p489_p10), %vm501_vm0, %v496_v3  ;;  %v499_v6 = vld [vmem:[%s2493_s0 + $0x30] sm:$0xff] (!%p489_p10) }
  0x15   : > { %s2170_s12 = scalar_select %p463_p7, %s2039_s14, 2 }
  0x16   : > { %506 = vst.msk [vmem:[#allocation2 + $0x20] sm:$0xff] (!%p489_p10), %vm501_vm0, %v497_v4  ;;  %507 = vst.msk [vmem:[#allocation2 + $0x28] sm:$0xff] (!%p489_p10), %vm501_vm0, %v498_v5  ;;  %v500_v7 = vld [vmem:[%s2493_s0 + $0x38] sm:$0xff] (!%p489_p10) }
  0x17   : > { %s1613_s22 = sshll.u32 %s2170_s12, 3  ;;  %s1691_s29 = sshll.u32 %s2170_s12, 6  ;;  %508 = vst.msk [vmem:[#allocation2 + $0x30] sm:$0xff] (!%p489_p10), %vm501_vm0, %v499_v6  ;;  %509 = vst.msk [vmem:[#allocation2 + $0x38] sm:$0xff] (!%p489_p10), %vm501_vm0, %v500_v7 }
  0x18   : > { %s2180_s28 = scalar_lea.vmem %s2497_s4, %s1613_s22  ;;  %s2186_s1 = scalar_lea.vmem %s2499_s6, %s1691_s29 }
  0x19   : > { %s477_s16 = scalar_lea.vmem %s2500_s7, %s2170_s12  ;;  %s2195_s23 = scalar_lea.vmem %s2501_s8, %s1691_s29 }
  0x1a   : > { %s485_s24 = scalar_lea.vmem %s2502_s9, %s2170_s12 }
  0x1b PF: > { %p1618_p11 = scmp.ne.s32.totalorder %s2035_s13, 0 }
  0x1c   : > { %vm513_vm1 = vcmask (!%p1618_p11), 523264   ;;  %v2053_v8 = vmov (!%p1618_p11), 0.0  }
  0x1d   : > { %512 = sbr.rel (%p1618_p11) target bundleno = 36 (0x24), region = 68  ;;  %514 = vst.msk [vmem:[#allocation3] sm:$0xff] (!%p1618_p11), %vm513_vm1, %v2053_v8  ;;  %515 = vst.msk [vmem:[#allocation3 + $0x8] sm:$0xff] (!%p1618_p11), %vm513_vm1, %v2053_v8 }
  0x1e   : > { %516 = vst.msk [vmem:[#allocation3 + $0x10] sm:$0xff] (!%p1618_p11), %vm513_vm1, %v2053_v8  ;;  %517 = vst.msk [vmem:[#allocation3 + $0x18] sm:$0xff] (!%p1618_p11), %vm513_vm1, %v2053_v8 }
  0x1f   : > { %518 = vst.msk [vmem:[#allocation3 + $0x20] sm:$0xff] (!%p1618_p11), %vm513_vm1, %v2053_v8  ;;  %519 = vst.msk [vmem:[#allocation3 + $0x28] sm:$0xff] (!%p1618_p11), %vm513_vm1, %v2053_v8 }
  0x20   : > { %520 = vst.msk [vmem:[#allocation3 + $0x30] sm:$0xff] (!%p1618_p11), %vm513_vm1, %v2053_v8  ;;  %521 = vst.msk [vmem:[#allocation3 + $0x38] sm:$0xff] (!%p1618_p11), %vm513_vm1, %v2053_v8 }
  0x24 PF: > { %v613_v9 = vld [vmem:[%s2180_s28] sm:$0xff]  ;;  %vm621_vm2 = vcmask 64512   ;;  %v598_v11 = vld [vmem:[%s2164_s11 + $0x8] sm:$0xff]  ;;  %v522_v12 = vlaneseq  ;;  %v599_v13 = vld [vmem:[%s2164_s11 + $0x10] sm:$0xff]  ;;  %s2514_s17 = scalar_lea.vmem %s2496_s3, %s2150_s21  ;;  %v2054_v21 = vmov 0.0   ;;  %vm843_vm11 = vcmask 523264   ;;  %s2515_s20 = scalar_lea.vmem %s2498_s5, %s2170_s12 }
  0x25   : > { %v597_v10 = vld [vmem:[%s2164_s11] sm:$0xff]  ;;  %1766 = vmatprep.subr.mxu0 %v613_v9  ;;  %v600_v16 = vld [vmem:[%s2164_s11 + $0x18] sm:$0xff]  ;;  %v816_v29 = vld [vmem:[#allocation2 + $0x8] sm:$0xff]  ;;  %s2055_s29 = smov 32   ;;  %s2516_s26 = scalar_lea.vmem %s2495_s2, %s2150_s21 }
  0x26   : > { %1768 = vmatprep.mubr.msk.f32.mxu0 %vm621_vm2, %v597_v10  ;;  %1767 = vmatpush3.msra.mxu0 %v613_v9  ;;  %v2231_v14 = vshrl.u32 %v522_v12, 7  ;;  %v1619_v15 = vld [vmem:[%s2514_s17] ss:$0 sm:$0xff]  ;;  %v817_v30 = vld [vmem:[#allocation2 + $0x10] sm:$0xff]  ;;  %v818_v31 = vld [vmem:[#allocation2 + $0x18] sm:$0xff]  ;;  %p1670_p12 = scmp.ne.s32.totalorder %s2035_s13, 1 }
  0x27   : > { %1769 = vmatmul.mubr.msk.f32.vlgmr.msra.gmra.mrb[0].mxu0 %vm621_vm2, %v598_v11  ;;  %v601_v20 = vld [vmem:[%s2164_s11 + $0x20] sm:$0xff]  ;;  %v602_v32 = vld [vmem:[%s2164_s11 + $0x28] sm:$0xff]  ;;  %v603_v35 = vld [vmem:[%s2164_s11 + $0x30] sm:$0xff]  ;;  %v824_v39 = vpack.c.bf16 %v818_v31, %v817_v30 }
  0x28   : > { %1771 = vmatprep.mubr.msk.f32.mxu0 %vm621_vm2, %v599_v13  ;;  %v2242_v17 = vadd.s32 8, %v2231_v14  ;;  %vm536_vm3 = vcmp.eq.s32.totalorder %v2231_v14, %v1619_v15  ;;  %v2246_v18 = vadd.s32 16, %v2231_v14  ;;  %v2249_v19 = vadd.s32 24, %v2231_v14  ;;  %v815_v25 = vld [vmem:[#allocation2] sm:$0xff]  ;;  %v820_v43 = vld [vmem:[#allocation2 + $0x28] sm:$0xff]  ;;  %v604_v44 = vld [vmem:[%s2164_s11 + $0x38] sm:$0xff] }
  0x29   : > { %v1620_v22 = vsel %vm536_vm3, 1.0, %v2054_v21  ;;  %v2253_v23 = vadd.s32 32, %v2231_v14  ;;  %v2256_v24 = vadd.s32 40, %v2231_v14  ;;  %v2267_v34 = vadd.s32 48, %v2231_v14  ;;  %v819_v42 = vld [vmem:[#allocation2 + $0x20] sm:$0xff]  ;;  %v821_v50 = vld [vmem:[#allocation2 + $0x30] sm:$0xff] }
  0x2a   : > { %vm537_vm4 = vcmp.eq.s32.totalorder %v2242_v17, %v1619_v15  ;;  %vm538_vm5 = vcmp.eq.s32.totalorder %v2246_v18, %v1619_v15  ;;  %vm539_vm6 = vcmp.eq.s32.totalorder %v2249_v19, %v1619_v15  ;;  %v2271_v36 = vadd.s32 56, %v2231_v14  ;;  %v605_v45 = vld [vmem:[%s2164_s11 + $0x40] sm:$0xff]  ;;  %v822_v51 = vld [vmem:[#allocation2 + $0x38] sm:$0xff]  ;;  %v606_v52 = vld [vmem:[%s2164_s11 + $0x48] sm:$0xff] }
  0x2b   : > { %1772 = vmatmul.mubr.msk.f32.gmra.mrb[2].mxu0 %vm621_vm2, %v600_v16  ;;  %v1621_v26 = vsel %vm537_vm4, 1.0, %v2054_v21  ;;  %v1622_v27 = vsel %vm538_vm5, 1.0, %v2054_v21  ;;  %v1623_v28 = vsel %vm539_vm6, 1.0, %v2054_v21  ;;  %vm540_vm7 = vcmp.eq.s32.totalorder %v2253_v23, %v1619_v15  ;;  %v607_v53 = vld [vmem:[%s2164_s11 + $0x50] sm:$0xff]  ;;  %v608_v56 = vld [vmem:[%s2164_s11 + $0x58] sm:$0xff]  ;;  %v609_v57 = vld [vmem:[%s2164_s11 + $0x60] sm:$0xff] }
  0x2c   : > { %1774 = vmatprep.mubr.msk.f32.mxu0 %vm621_vm2, %v601_v20  ;;  %v560_v33 = vpack.c.bf16 %v1621_v26, %v1620_v22  ;;  %vm541_vm8 = vcmp.eq.s32.totalorder %v2256_v24, %v1619_v15  ;;  %v561_v37 = vpack.c.bf16 %v1623_v28, %v1622_v27  ;;  %v823_v38 = vpack.c.bf16 %v816_v29, %v815_v25  ;;  %v610_v58 = vld [vmem:[%s2164_s11 + $0x68] sm:$0xff]  ;;  %v611_v59 = vld [vmem:[%s2164_s11 + $0x70] sm:$0xff]  ;;  %v612_v60 = vld [vmem:[%s2164_s11 + $0x78] sm:$0xff] }
  0x2d   : > { %v1624_v40 = vsel %vm540_vm7, 1.0, %v2054_v21  ;;  %v1625_v41 = vsel %vm541_vm8, 1.0, %v2054_v21  ;;  %vm542_vm9 = vcmp.eq.s32.totalorder %v2267_v34, %v1619_v15  ;;  %vm543_vm10 = vcmp.eq.s32.totalorder %v2271_v36, %v1619_v15  ;;  %v1637_v5 = vld [vmem:[%s2515_s20] ss:$0 sm:$0xff] }
  0x2e   : > { %827 = vxpose.xlu0.c.b16.start [1/4] (short) %v560_v33, 128  ;;  %1792 = vmatprep.subr.bf16.mxu1 %v823_v38  ;;  %v562_v46 = vpack.c.bf16 %v1625_v41, %v1624_v40  ;;  %v825_v47 = vpack.c.bf16 %v820_v43, %v819_v42  ;;  %v1626_v48 = vsel %vm542_vm9, 1.0, %v2054_v21  ;;  %v1627_v49 = vsel %vm543_vm10, 1.0, %v2054_v21  ;;  %v2317_v40 = vld [vmem:[%s2516_s26] ss:$0 sm:$0xff] }
  0x2f   : > { %1775 = vmatmul.mubr.msk.f32.gmra.mrb[4].mxu0 %vm621_vm2, %v602_v32  ;;  %1793 = vmatpush3.bf16.msra.mxu1 %v823_v38  ;;  %v563_v54 = vpack.c.bf16 %v1627_v49, %v1626_v48  ;;  %v826_v55 = vpack.c.bf16 %v822_v51, %v821_v50  ;;  %vm571_vm12 = vcmp.eq.s32.totalorder %v2246_v18, %v2317_v40 }
  0x30   : > { %1777 = vmatprep.mubr.msk.f32.mxu0 %vm621_vm2, %v603_v35  ;;  %1794 = vmatprep.subr.bf16.mxu1 %v824_v39  ;;  %vm572_vm13 = vcmp.eq.s32.totalorder %v2249_v19, %v2317_v40  ;;  %vm569_vm14 = vcmp.eq.s32.totalorder %v2231_v14, %v2317_v40  ;;  %vm570_vm15 = vcmp.eq.s32.totalorder %v2242_v17, %v2317_v40 }
  0x31   : > { %vm2329_vm0 = vmpackc.low %vm572_vm13, %vm571_vm12  ;;  %vm573_vm3 = vcmp.eq.s32.totalorder %v2253_v23, %v2317_v40  ;;  %vm574_vm4 = vcmp.eq.s32.totalorder %v2256_v24, %v2317_v40  ;;  %vm575_vm6 = vcmp.eq.s32.totalorder %v2267_v34, %v2317_v40  ;;  %vm576_vm7 = vcmp.eq.s32.totalorder %v2271_v36, %v2317_v40  ;;  %v1056_v23 = vld [vmem:[#allocation3 + $0x10] sm:$0xff]  ;;  %v1054_v24 = vld [vmem:[#allocation3] sm:$0xff] }
  0x32   : > { %828 = vxpose.xlu0.c.b16.cont [2/4] (short) %v561_v37, 128  ;;  %vm1662_vm1 = vmpackc.low %vm570_vm15, %vm569_vm14  ;;  %v1060_v36 = vld [vmem:[#allocation3 + $0x30] sm:$0xff]  ;;  %v1058_v40 = vld [vmem:[#allocation3 + $0x20] sm:$0xff] }
  0x33   : > { %1778 = vmatmul.mubr.msk.f32.gmra.mrb[6].mxu0 %vm621_vm2, %v604_v44  ;;  %1795 = vmatpush3.bf16.msra.mxu1 %v824_v39  ;;  %vm1666_vm5 = vmpackc.low %vm574_vm4, %vm573_vm3 }
  0x34   : > { %1780 = vmatprep.mubr.msk.f32.mxu0 %vm621_vm2, %v605_v45  ;;  %1796 = vmatprep.subr.bf16.mxu1 %v825_v47  ;;  %vm1668_vm8 = vmpackc.low %vm576_vm7, %vm575_vm6 }
  0x36   : > { %829 = vxpose.xlu0.c.b16.cont [3/4] (short) %v562_v46, 128 }
  0x37   : > { %1781 = vmatmul.mubr.msk.f32.gmra.mrb[8].mxu0 %vm621_vm2, %v606_v52  ;;  %1797 = vmatpush3.bf16.msra.mxu1 %v825_v47  ;;  %v2056_v52 = vmov 1.0|1.0  }
  0x38   : > { %1783 = vmatprep.mubr.msk.f32.mxu0 %vm621_vm2, %v607_v53  ;;  %1798 = vmatprep.subr.bf16.mxu1 %v826_v55 }
  0x3a   : > { %830 = vxpose.xlu0.c.b16.end [4/4] (short) %v563_v54, 128 }
  0x3b   : > { %1784 = vmatmul.mubr.msk.f32.gmra.mrb[10].mxu0 %vm621_vm2, %v608_v56  ;;  %1799 = vmatpush3.bf16.msra.mxu1 %v826_v55 }
  0x3c   : > { %1786 = vmatprep.mubr.msk.f32.mxu0 %vm621_vm2, %v609_v57 }
  0x3f   : > { %1787 = vmatmul.mubr.msk.f32.gmra.mrb[12].mxu0 %vm621_vm2, %v610_v58 }
  0x40   : > { %1789 = vmatprep.mubr.msk.f32.mxu0 %vm621_vm2, %v611_v59 }
  0x43   : > { %1790 = vmatmul.mubr.msk.f32.gmra.mrb[14].mxu0 %vm621_vm2, %v612_v60  ;;  %vm1029_vm2 = vcmask 261120  }
  0x44   : > { %1832 = vmatprep.mubr.msk.bf16.mxu0 %vm1662_vm1, %v2056_v52 }
  0x94   : > { %v835_v61 = vpop.trf.xlu0 }
  0x95   : > { %1800 = vmatprep.mubr.msk.bf16.mxu1 %vm843_vm11, %v835_v61 }
  0x98   : > { %v836_v62 = vpop.trf.xlu0 }
  0x99   : > { %1801 = vmatmul.mubr.msk.bf16.vlgmr.msra.gmra.mrb[0].mxu1 %vm843_vm11, %v836_v62 }
  0x9c   : > { %v837_v63 = vpop.trf.xlu0 }
  0x9d   : > { %1804 = vmatprep.mubr.msk.bf16.mxu1 %vm843_vm11, %v837_v63 }
  0xa0   : > { %v838_v0 = vpop.trf.xlu0 }
  0xa1   : > { %1805 = vmatmul.mubr.msk.bf16.gmra.mrb[4].mxu1 %vm843_vm11, %v838_v0 }
  0xa4   : > { %v839_v1 = vpop.trf.xlu0 }
  0xa5   : > { %1808 = vmatprep.mubr.msk.bf16.mxu1 %vm843_vm11, %v839_v1 }
  0xa8   : > { %v840_v2 = vpop.trf.xlu0 }
  0xa9   : > { %1809 = vmatmul.mubr.msk.bf16.gmra.mrb[8].mxu1 %vm843_vm11, %v840_v2 }
  0xac   : > { %v841_v3 = vpop.trf.xlu0 }
  0xad   : > { %1812 = vmatprep.mubr.msk.bf16.mxu1 %vm843_vm11, %v841_v3 }
  0xb0   : > { %v842_v4 = vpop.trf.xlu0 }
  0xb1   : > { %1813 = vmatmul.mubr.msk.bf16.gmra.mrb[12].mxu1 %vm843_vm11, %v842_v4 }
  0xfa   : > { %v1770_v6 = vpop.f32.mrb[0].mxu0 }
  0xfb   : > { %v742_v7 = vadd.f32 %v1770_v6, %v1637_v5  ;;  %v736_v8 = vpop.f32.mrb[1].mxu0 }
  0xfc   : > { %v737_v9 = vadd.f32 %v1637_v5, %v736_v8 }
  0xfe   : > { %v1773_v10 = vpop.f32.mrb[2].mxu0  ;;  %v1973_v11 = vpack.i.bf16 %v742_v7, %v737_v9 }
  0xff   : > { %v752_v12 = vadd.f32 %v1773_v10, %v1637_v5  ;;  %v746_v13 = vpop.f32.mrb[3].mxu0 }
 0x100   : > { %v747_v15 = vadd.f32 %v1637_v5, %v746_v13  ;;  %1974 = vrot.lane.b32.xlu1 %v1973_v11, %s2055_s29 }
 0x102   : > { %v1978_v16 = vpack.i.bf16 %v752_v12, %v747_v15  ;;  %v1776_v20 = vpop.f32.mrb[4].mxu0 }
 0x103   : > { %v762_v21 = vadd.f32 %v1776_v20, %v1637_v5  ;;  %v756_v22 = vpop.f32.mrb[5].mxu0 }
 0x104   : > { %v757_v25 = vadd.f32 %v1637_v5, %v756_v22  ;;  %1979 = vrot.lane.b32.xlu1 %v1978_v16, %s2055_s29 }
 0x106   : > { %v1983_v26 = vpack.i.bf16 %v762_v21, %v757_v25  ;;  %v1779_v27 = vpop.f32.mrb[6].mxu0 }
 0x107   : > { %v772_v28 = vadd.f32 %v1779_v27, %v1637_v5  ;;  %v766_v29 = vpop.f32.mrb[7].mxu0 }
 0x108   : > { %v767_v30 = vadd.f32 %v1637_v5, %v766_v29  ;;  %1984 = vrot.lane.b32.xlu1 %v1983_v26, %s2055_s29 }
 0x10a   : > { %v1988_v31 = vpack.i.bf16 %v772_v28, %v767_v30  ;;  %v1782_v32 = vpop.f32.mrb[8].mxu0 }
 0x10b   : > { %v782_v33 = vadd.f32 %v1782_v32, %v1637_v5  ;;  %v776_v35 = vpop.f32.mrb[9].mxu0 }
 0x10c   : > { %v777_v37 = vadd.f32 %v1637_v5, %v776_v35  ;;  %1989 = vrot.lane.b32.xlu1 %v1988_v31, %s2055_s29 }
 0x10e   : > { %v1993_v38 = vpack.i.bf16 %v782_v33, %v777_v37  ;;  %v1785_v39 = vpop.f32.mrb[10].mxu0 }
 0x10f   : > { %v792_v41 = vadd.f32 %v1785_v39, %v1637_v5  ;;  %v786_v42 = vpop.f32.mrb[11].mxu0 }
 0x110   : > { %v787_v43 = vadd.f32 %v1637_v5, %v786_v42  ;;  %1994 = vrot.lane.b32.xlu0 %v1993_v38, %s2055_s29 }
 0x112   : > { %v1998_v44 = vpack.i.bf16 %v792_v41, %v787_v43  ;;  %v1788_v45 = vpop.f32.mrb[12].mxu0 }
 0x113   : > { %v802_v46 = vadd.f32 %v1788_v45, %v1637_v5  ;;  %v796_v47 = vpop.f32.mrb[13].mxu0 }
 0x114   : > { %v797_v48 = vadd.f32 %v1637_v5, %v796_v47  ;;  %1999 = vrot.lane.b32.xlu1 %v1998_v44, %s2055_s29 }
 0x116   : > { %v2003_v18 = vpack.i.bf16 %v802_v46, %v797_v48  ;;  %v1791_v50 = vpop.f32.mrb[14].mxu0 }
 0x117   : > { %v812_v19 = vadd.f32 %v1791_v50, %v1637_v5  ;;  %v806_v51 = vpop.f32.mrb[15].mxu0 }
 0x118   : > { %v807_v53 = vadd.f32 %v1637_v5, %v806_v51  ;;  %2004 = vrot.lane.b32.xlu1 %v2003_v18, %s2055_s29 }
 0x11a   : > { %v2008_v54 = vpack.i.bf16 %v812_v19, %v807_v53 }
 0x11c   : > { %2009 = vrot.lane.b32.xlu1 %v2008_v54, %s2055_s29 }
 0x16c   : > { %v1802_v14 = vpop.f32.mrb[0].mxu1 }
 0x16d   : > { %v902_v17 = vpop.f32.mrb[1].mxu1 }
 0x16e   : > { %v1803_v55 = vpop.f32.mrb[2].mxu1 }
 0x16f   : > { %v905_v56 = vpop.f32.mrb[3].mxu1 }
 0x172   : > { %v1975_v57 = vpop.permute.xlu1 %1974 }
 0x173   : > { %v1977_v58 = vunpack.i.h.bf16 %v1975_v57  ;;  %v1976_v59 = vunpack.i.l.bf16 %v1975_v57 }
 0x174   : > { %v1806_v60 = vpop.f32.mrb[4].mxu1 }
 0x175   : > { %v918_v61 = vpop.f32.mrb[5].mxu1  ;;  %v1030_v62 = vsel %vm1029_vm2, %v902_v17, %v1976_v59  ;;  %v1031_v63 = vsel %vm1029_vm2, %v905_v56, %v1977_v58 }
 0x176   : > { %v1980_v0 = vpop.permute.xlu1 %1979  ;;  %v1807_v1 = vpop.f32.mrb[6].mxu1  ;;  %v1046_v2 = vpack.c.bf16 %v1031_v63, %v1030_v62 }
 0x177   : > { %v1982_v3 = vunpack.i.h.bf16 %v1980_v0  ;;  %v1981_v4 = vunpack.i.l.bf16 %v1980_v0  ;;  %v921_v5 = vpop.f32.mrb[7].mxu1  ;;  %v1055_v0 = vld [vmem:[#allocation3 + $0x8] sm:$0xff] }
 0x178   : > { %1816 = vmatprep.subr.bf16.mxu0 %v1046_v2 }
 0x179   : > { %1817 = vmatpush3.bf16.msra.mxu0 %v1046_v2  ;;  %v1032_v6 = vsel %vm1029_vm2, %v1802_v14, %v1981_v4  ;;  %v1033_v7 = vsel %vm1029_vm2, %v1803_v55, %v1982_v3  ;;  %v1061_v4 = vld [vmem:[#allocation3 + $0x38] sm:$0xff] }
 0x17a   : > { %v1985_v8 = vpop.permute.xlu1 %1984  ;;  %v1047_v9 = vpack.c.bf16 %v1033_v7, %v1032_v6  ;;  %v1059_v7 = vld [vmem:[#allocation3 + $0x28] sm:$0xff] }
 0x17b   : > { %v1987_v10 = vunpack.i.h.bf16 %v1985_v8  ;;  %v1986_v11 = vunpack.i.l.bf16 %v1985_v8 }
 0x17c   : > { %1818 = vmatprep.subr.bf16.mxu0 %v1047_v9  ;;  %v1810_v12 = vpop.f32.mrb[8].mxu1 }
 0x17d   : > { %1819 = vmatpush3.bf16.msra.mxu0 %v1047_v9  ;;  %v934_v13 = vpop.f32.mrb[9].mxu1  ;;  %v1034_v15 = vsel %vm1029_vm2, %v918_v61, %v1986_v11  ;;  %v1035_v16 = vsel %vm1029_vm2, %v921_v5, %v1987_v10  ;;  %v1057_v61 = vld [vmem:[#allocation3 + $0x18] sm:$0xff] }
 0x17e   : > { %v1990_v20 = vpop.permute.xlu1 %1989  ;;  %v1811_v21 = vpop.f32.mrb[10].mxu1  ;;  %v1048_v22 = vpack.c.bf16 %v1035_v16, %v1034_v15  ;;  %v1156_v15 = vld [vmem:[%s2186_s1 + $0x8] sm:$0xff] (!%p1670_p12)  ;;  %v1157_v16 = vld [vmem:[%s2186_s1 + $0x10] sm:$0xff] (!%p1670_p12) }
 0x17f   : > { %v1992_v25 = vunpack.i.h.bf16 %v1990_v20  ;;  %v1991_v26 = vunpack.i.l.bf16 %v1990_v20  ;;  %v937_v27 = vpop.f32.mrb[11].mxu1 }
 0x180   : > { %1820 = vmatprep.subr.bf16.mxu0 %v1048_v22 }
 0x181   : > { %1821 = vmatpush3.bf16.msra.mxu0 %v1048_v22  ;;  %v1036_v28 = vsel %vm1029_vm2, %v1806_v60, %v1991_v26  ;;  %v1037_v29 = vsel %vm1029_vm2, %v1807_v1, %v1992_v25  ;;  %v1159_v25 = vld [vmem:[%s2186_s1 + $0x20] sm:$0xff] (!%p1670_p12)  ;;  %v1160_v26 = vld [vmem:[%s2186_s1 + $0x28] sm:$0xff] (!%p1670_p12) }
 0x182   : > { %v1995_v30 = vpop.permute.xlu0 %1994  ;;  %v1049_v31 = vpack.c.bf16 %v1037_v29, %v1036_v28  ;;  %v1904_v28 = vpack.c.bf16 (!%p1670_p12), %v1160_v26, %v1159_v25  ;;  %v1161_v29 = vld [vmem:[%s2186_s1 + $0x30] sm:$0xff] (!%p1670_p12) }
 0x183   : > { %v1997_v32 = vunpack.i.h.bf16 %v1995_v30  ;;  %v1996_v33 = vunpack.i.l.bf16 %v1995_v30  ;;  %v1307_v30 = vld [vmem:[%s2195_s23] sm:$0xff] (!%p1670_p12) }
 0x184   : > { %1822 = vmatprep.subr.bf16.mxu0 %v1049_v31  ;;  %v1814_v35 = vpop.f32.mrb[12].mxu1 }
 0x185   : > { %1823 = vmatpush3.bf16.msra.mxu0 %v1049_v31  ;;  %v950_v37 = vpop.f32.mrb[13].mxu1  ;;  %v1038_v38 = vsel %vm1029_vm2, %v934_v13, %v1996_v33  ;;  %v1039_v39 = vsel %vm1029_vm2, %v937_v27, %v1997_v32  ;;  %v1155_v13 = vld [vmem:[%s2186_s1] sm:$0xff] (!%p1670_p12)  ;;  %v1308_v31 = vld [vmem:[%s2195_s23 + $0x8] sm:$0xff] (!%p1670_p12)  ;;  %v1162_v32 = vld [vmem:[%s2186_s1 + $0x38] sm:$0xff] (!%p1670_p12) }
 0x186   : > { %v2000_v41 = vpop.permute.xlu1 %1999  ;;  %v1815_v42 = vpop.f32.mrb[14].mxu1  ;;  %v1050_v43 = vpack.c.bf16 %v1039_v39, %v1038_v38  ;;  %v1896_v20 = vpack.c.bf16 (!%p1670_p12), %v1156_v15, %v1155_v13  ;;  %v1912_v33 = vpack.c.bf16 (!%p1670_p12), %v1308_v31, %v1307_v30  ;;  %v1311_v39 = vld [vmem:[%s2195_s23 + $0x20] sm:$0xff] (!%p1670_p12) }
 0x187   : > { %v2002_v44 = vunpack.i.h.bf16 %v2000_v41  ;;  %v2001_v45 = vunpack.i.l.bf16 %v2000_v41  ;;  %v953_v46 = vpop.f32.mrb[15].mxu1  ;;  %v1312_v41 = vld [vmem:[%s2195_s23 + $0x28] sm:$0xff] (!%p1670_p12) }
 0x188   : > { %1824 = vmatprep.subr.bf16.mxu0 %v1050_v43  ;;  %1913 = vmatprep.subr.bf16.mxu1 (!%p1670_p12), %v1912_v33 }
 0x189   : > { %1825 = vmatpush3.bf16.msra.mxu0 %v1050_v43  ;;  %v1040_v47 = vsel %vm1029_vm2, %v1810_v12, %v2001_v45  ;;  %v1041_v48 = vsel %vm1029_vm2, %v1811_v21, %v2002_v44  ;;  %v1158_v21 = vld [vmem:[%s2186_s1 + $0x18] sm:$0xff] (!%p1670_p12)  ;;  %1915 = vmatpush3.bf16.msra.mxu1 (!%p1670_p12), %v1912_v33  ;;  %v1920_v43 = vpack.c.bf16 (!%p1670_p12), %v1312_v41, %v1311_v39 }
 0x18a   : > { %v2005_v18 = vpop.permute.xlu1 %2004  ;;  %v1051_v50 = vpack.c.bf16 %v1041_v48, %v1040_v47  ;;  %v1900_v22 = vpack.c.bf16 (!%p1670_p12), %v1158_v21, %v1157_v16 }
 0x18b   : > { %v2007_v19 = vunpack.i.h.bf16 %v2005_v18  ;;  %v2006_v51 = vunpack.i.l.bf16 %v2005_v18 }
 0x18c   : > { %1826 = vmatprep.subr.bf16.mxu0 %v1051_v50 }
 0x18d   : > { %1827 = vmatpush3.bf16.msra.mxu0 %v1051_v50  ;;  %v1042_v53 = vsel %vm1029_vm2, %v950_v37, %v2006_v51  ;;  %v1043_v54 = vsel %vm1029_vm2, %v953_v46, %v2007_v19  ;;  %v1310_v37 = vld [vmem:[%s2195_s23 + $0x18] sm:$0xff] (!%p1670_p12)  ;;  %v1313_v19 = vld [vmem:[%s2195_s23 + $0x30] sm:$0xff] (!%p1670_p12) }
 0x18e   : > { %v2010_v14 = vpop.permute.xlu1 %2009  ;;  %v1052_v17 = vpack.c.bf16 %v1043_v54, %v1042_v53  ;;  %v1314_v51 = vld [vmem:[%s2195_s23 + $0x38] sm:$0xff] (!%p1670_p12)  ;;  %v1671_v54 = vld [vmem:[%s477_s16] ss:$0 sm:$0xff] (!%p1670_p12) }
 0x18f   : > { %v2012_v55 = vunpack.i.h.bf16 %v2010_v14  ;;  %v2011_v56 = vunpack.i.l.bf16 %v2010_v14  ;;  %v1924_v53 = vpack.c.bf16 (!%p1670_p12), %v1314_v51, %v1313_v19 }
 0x190   : > { %1828 = vmatprep.subr.bf16.mxu0 %v1052_v17 }
 0x191   : > { %1829 = vmatpush3.bf16.msra.mxu0 %v1052_v17  ;;  %v1044_v57 = vsel %vm1029_vm2, %v1814_v35, %v2011_v56  ;;  %v1045_v58 = vsel %vm1029_vm2, %v1815_v42, %v2012_v55  ;;  %v1309_v35 = vld [vmem:[%s2195_s23 + $0x10] sm:$0xff] (!%p1670_p12)  ;;  %v1908_v42 = vpack.c.bf16 (!%p1670_p12), %v1162_v32, %v1161_v29 }
 0x192   : > { %v1053_v59 = vpack.c.bf16 %v1045_v58, %v1044_v57  ;;  %v1916_v38 = vpack.c.bf16 (!%p1670_p12), %v1310_v37, %v1309_v35 }
 0x194   : > { %1830 = vmatprep.subr.bf16.mxu0 %v1053_v59  ;;  %1917 = vmatprep.subr.bf16.mxu1 (!%p1670_p12), %v1916_v38 }
 0x195   : > { %1831 = vmatpush3.bf16.msra.mxu0 %v1053_v59  ;;  %1919 = vmatpush3.bf16.msra.mxu1 (!%p1670_p12), %v1916_v38 }
 0x196   : > { %1897 = vmatprep.subr.bf16.mxu0 (!%p1670_p12), %v1896_v20  ;;  %1921 = vmatprep.subr.bf16.mxu1 (!%p1670_p12), %v1920_v43 }
 0x198   : > { %1833 = vmatmul.mubr.msk.bf16.vlgmr.msra.gmra.mrb[16].mxu0 %vm2329_vm0, %v2056_v52 }
 0x199   : > { %1836 = vmatprep.mubr.msk.bf16.mxu0 %vm1666_vm5, %v2056_v52  ;;  %1899 = vmatpush3.bf16.msra.mxu0 (!%p1670_p12), %v1896_v20 }
 0x19a   : > { %1901 = vmatprep.subr.bf16.mxu0 (!%p1670_p12), %v1900_v22  ;;  %1923 = vmatpush3.bf16.msra.mxu1 (!%p1670_p12), %v1920_v43 }
 0x19b   : > { %1925 = vmatprep.subr.bf16.mxu1 (!%p1670_p12), %v1924_v53 }
 0x19d   : > { %1903 = vmatpush3.bf16.msra.mxu0 (!%p1670_p12), %v1900_v22 }
 0x19e   : > { %1905 = vmatprep.subr.bf16.mxu0 (!%p1670_p12), %v1904_v28  ;;  %1927 = vmatpush3.bf16.msra.mxu1 (!%p1670_p12), %v1924_v53 }
 0x1a0   : > { %1837 = vmatmul.mubr.msk.bf16.gmra.mrb[20].mxu0 %vm1668_vm8, %v2056_v52 }
 0x1a1   : > { %1907 = vmatpush3.bf16.msra.mxu0 (!%p1670_p12), %v1904_v28 }
 0x1a2   : > { %1909 = vmatprep.subr.bf16.mxu0 (!%p1670_p12), %v1908_v42 }
 0x1a5   : > { %1911 = vmatpush3.bf16.msra.mxu0 (!%p1670_p12), %v1908_v42 }
 0x26b   : > { %v1834_v60 = vpop.f32.mrb[16].mxu0 }
 0x26c   : > { %v1129_v62 = vadd.f32 %v1834_v60, %v1056_v23  ;;  %v1096_v63 = vpop.f32.mrb[17].mxu0 }
 0x26d   : > { %v1127_v49 = vadd.f32 %v1096_v63, %v1054_v24  ;;  %v1835_v1 = vpop.f32.mrb[18].mxu0 }
 0x26e   : > { %1137 = vst.msk [vmem:[#allocation3 + $0x10] sm:$0xff] %vm843_vm11, %v1129_v62  ;;  %v1130_v2 = vadd.f32 %v1835_v1, %v1057_v61  ;;  %v1099_v3 = vpop.f32.mrb[19].mxu0 }
 0x26f   : > { %1135 = vst.msk [vmem:[#allocation3] sm:$0xff] %vm843_vm11, %v1127_v49  ;;  %v1128_v34 = vadd.f32 %v1099_v3, %v1055_v0 }
 0x270   : > { %1138 = vst.msk [vmem:[#allocation3 + $0x18] sm:$0xff] %vm843_vm11, %v1130_v2 }
 0x271   : > { %1136 = vst.msk [vmem:[#allocation3 + $0x8] sm:$0xff] %vm843_vm11, %v1128_v34 }
 0x273   : > { %v1838_v52 = vpop.f32.mrb[20].mxu0  ;;  %1146 = sbr.rel (%p1670_p12) target bundleno = 1082 (0x43a), region = 72 }
 0x274   : > { %v1133_v5 = vadd.f32 %v1838_v52, %v1060_v36  ;;  %v1112_v6 = vpop.f32.mrb[21].mxu0 }
 0x275   : > { %v1131_v8 = vadd.f32 %v1112_v6, %v1058_v40  ;;  %v1839_v9 = vpop.f32.mrb[22].mxu0  ;;  %v1149_v45 = vld [vmem:[#allocation3 + $0x10] sm:$0xff] (!%p1670_p12)  ;;  %v1680_v6 = vld [vmem:[%s485_s24] ss:$0 sm:$0xff] (!%p1670_p12) }
 0x276   : > { %1141 = vst.msk [vmem:[#allocation3 + $0x30] sm:$0xff] %vm843_vm11, %v1133_v5  ;;  %v1134_v10 = vadd.f32 %v1839_v9, %v1061_v4  ;;  %v1115_v11 = vpop.f32.mrb[23].mxu0  ;;  %v1147_v27 = vld [vmem:[#allocation3] sm:$0xff] (!%p1670_p12) }
 0x277   : > { %1139 = vst.msk [vmem:[#allocation3 + $0x20] sm:$0xff] %vm843_vm11, %v1131_v8  ;;  %v1132_v12 = vadd.f32 %v1115_v11, %v1059_v7  ;;  %1856 = vmatprep.mubr.msk.f32.mxu0 (!%p1670_p12), %vm843_vm11, %v1147_v27  ;;  %v1150_v46 = vld [vmem:[#allocation3 + $0x18] sm:$0xff] (!%p1670_p12) }
 0x278   : > { %1142 = vst.msk [vmem:[#allocation3 + $0x38] sm:$0xff] %vm843_vm11, %v1134_v10  ;;  %v1148_v44 = vld [vmem:[#allocation3 + $0x8] sm:$0xff] (!%p1670_p12) }
 0x279   : > { %1140 = vst.msk [vmem:[#allocation3 + $0x28] sm:$0xff] %vm843_vm11, %v1132_v12  ;;  %1857 = vmatmul.mubr.msk.f32.vlgmr.msra.gmra.mrb[0].mxu0 (!%p1670_p12), %vm843_vm11, %v1148_v44 }
 0x27a   : > { %1859 = vmatprep.mubr.msk.f32.mxu0 %vm843_vm11, %v1149_v45  ;;  %s1460_s16 = scalar_select %p463_p7, 1, 0 }
 0x27c   : > { %v1461_v7 = vstv %s1460_s16 }
 0x27d   : > { %1860 = vmatmul.mubr.msk.f32.gmra.mrb[2].mxu0 %vm843_vm11, %v1150_v46  ;;  %v1153_v18 = vld [vmem:[#allocation3 + $0x30] sm:$0xff]  ;;  %vm2418_vm9 = vcmp.eq.s32.totalorder %v1461_v7, 1 }
 0x27e   : > { %v1151_v47 = vld [vmem:[#allocation3 + $0x20] sm:$0xff] }
 0x27f   : > { %1862 = vmatprep.mubr.msk.f32.mxu0 %vm843_vm11, %v1151_v47  ;;  %v1154_v50 = vld [vmem:[#allocation3 + $0x38] sm:$0xff] }
 0x280   : > { %v1152_v48 = vld [vmem:[#allocation3 + $0x28] sm:$0xff] }
 0x281   : > { %1863 = vmatmul.mubr.msk.f32.gmra.mrb[4].mxu0 %vm843_vm11, %v1152_v48 }
 0x282   : > { %1865 = vmatprep.mubr.msk.f32.mxu0 %vm843_vm11, %v1153_v18 }
 0x285   : > { %1866 = vmatmul.mubr.msk.f32.gmra.mrb[6].mxu0 %vm843_vm11, %v1154_v50 }
 0x34c   : > { %v1858_v14 = vpop.f32.mrb[0].mxu0 }
 0x34d   : > { %v1266_v17 = vadd.f32 %v1858_v14, %v1671_v54  ;;  %v1260_v55 = vpop.f32.mrb[1].mxu0 }
 0x34e   : > { %v1261_v56 = vadd.f32 %v1671_v54, %v1260_v55 }
 0x34f   : > { %v1300_v59 = vmax.f32 %v1266_v17, 0.0 }
 0x350   : > { %v1861_v57 = vpop.f32.mrb[2].mxu0  ;;  %v1299_v58 = vmax.f32 %v1261_v56, 0.0 }
 0x351   : > { %v1276_v23 = vadd.f32 %v1861_v57, %v1671_v54  ;;  %v1270_v24 = vpop.f32.mrb[3].mxu0 }
 0x352   : > { %v1271_v60 = vadd.f32 %v1671_v54, %v1270_v24  ;;  %1884 = vmatprep.mubr.msk.f32.mxu1 %vm843_vm11, %v1299_v58 }
 0x353   : > { %1885 = vmatmul.mubr.msk.f32.vlgmr.msra.gmra.mrb[0].mxu1 %vm843_vm11, %v1300_v59  ;;  %v1302_v63 = vmax.f32 %v1276_v23, 0.0 }
 0x354   : > { %v1301_v61 = vmax.f32 %v1271_v60, 0.0  ;;  %v1864_v62 = vpop.f32.mrb[4].mxu0 }
 0x355   : > { %v1286_v0 = vadd.f32 %v1864_v62, %v1671_v54  ;;  %v1280_v49 = vpop.f32.mrb[5].mxu0 }
 0x356   : > { %v1281_v1 = vadd.f32 %v1671_v54, %v1280_v49  ;;  %1887 = vmatprep.mubr.msk.f32.mxu1 %vm843_vm11, %v1301_v61 }
 0x357   : > { %1888 = vmatmul.mubr.msk.f32.gmra.mrb[2].mxu1 %vm843_vm11, %v1302_v63  ;;  %v1304_v34 = vmax.f32 %v1286_v0, 0.0 }
 0x358   : > { %v1303_v2 = vmax.f32 %v1281_v1, 0.0  ;;  %v1867_v3 = vpop.f32.mrb[6].mxu0 }
 0x359   : > { %v1296_v36 = vadd.f32 %v1867_v3, %v1671_v54  ;;  %v1290_v40 = vpop.f32.mrb[7].mxu0 }
 0x35a   : > { %v1291_v52 = vadd.f32 %v1671_v54, %v1290_v40  ;;  %1890 = vmatprep.mubr.msk.f32.mxu1 %vm843_vm11, %v1303_v2 }
 0x35b   : > { %1891 = vmatmul.mubr.msk.f32.gmra.mrb[4].mxu1 %vm843_vm11, %v1304_v34  ;;  %v1306_v5 = vmax.f32 %v1296_v36, 0.0 }
 0x35c   : > { %v1305_v4 = vmax.f32 %v1291_v52, 0.0 }
 0x35e   : > { %1893 = vmatprep.mubr.msk.f32.mxu1 %vm843_vm11, %v1305_v4 }
 0x35f   : > { %1894 = vmatmul.mubr.msk.f32.gmra.mrb[6].mxu1 %vm843_vm11, %v1306_v5 }
 0x426   : > { %v1886_v8 = vpop.f32.mrb[0].mxu1 }
 0x427   : > { %v1418_v9 = vadd.f32 %v1886_v8, %v1680_v6  ;;  %v1412_v10 = vpop.f32.mrb[1].mxu1 }
 0x428   : > { %v1413_v12 = vadd.f32 %v1680_v6, %v1412_v10 }
 0x429   : > { %v1453_v13 = vmax.f32 %v1418_v9, 0.0 }
 0x42a   : > { %v1452_v15 = vmax.f32 %v1413_v12, 0.0  ;;  %v1889_v16 = vpop.f32.mrb[2].mxu1 }
 0x42b   : > { %v1464_v20 = vsel %vm2418_vm9, %v1453_v13, %v1418_v9  ;;  %v1428_v21 = vadd.f32 %v1889_v16, %v1680_v6  ;;  %v1422_v22 = vpop.f32.mrb[3].mxu1 }
 0x42c   : > { %1472 = vst.msk [vmem:[#allocation2 + $0x8] sm:$0xff] %vm1029_vm2, %v1464_v20  ;;  %1480 = vst.msk [vmem:[%s2503_s10 + $0x8] sm:$0xff] %vm1029_vm2, %v1464_v20  ;;  %v1463_v25 = vsel %vm2418_vm9, %v1452_v15, %v1413_v12  ;;  %v1423_v26 = vadd.f32 %v1680_v6, %v1422_v22 }
 0x42d   : > { %1471 = vst.msk [vmem:[#allocation2] sm:$0xff] %vm1029_vm2, %v1463_v25  ;;  %1479 = vst.msk [vmem:[%s2503_s10] sm:$0xff] %vm1029_vm2, %v1463_v25  ;;  %v1455_v27 = vmax.f32 %v1428_v21, 0.0 }
 0x42e   : > { %v1454_v28 = vmax.f32 %v1423_v26, 0.0  ;;  %v1892_v29 = vpop.f32.mrb[4].mxu1 }
 0x42f   : > { %v1466_v30 = vsel %vm2418_vm9, %v1455_v27, %v1428_v21  ;;  %v1438_v31 = vadd.f32 %v1892_v29, %v1680_v6  ;;  %v1432_v32 = vpop.f32.mrb[5].mxu1 }
 0x430   : > { %1474 = vst.msk [vmem:[#allocation2 + $0x18] sm:$0xff] %vm1029_vm2, %v1466_v30  ;;  %1482 = vst.msk [vmem:[%s2503_s10 + $0x18] sm:$0xff] %vm1029_vm2, %v1466_v30  ;;  %v1465_v33 = vsel %vm2418_vm9, %v1454_v28, %v1423_v26  ;;  %v1433_v35 = vadd.f32 %v1680_v6, %v1432_v32 }
 0x431   : > { %1473 = vst.msk [vmem:[#allocation2 + $0x10] sm:$0xff] %vm1029_vm2, %v1465_v33  ;;  %1481 = vst.msk [vmem:[%s2503_s10 + $0x10] sm:$0xff] %vm1029_vm2, %v1465_v33  ;;  %v1457_v37 = vmax.f32 %v1438_v31, 0.0 }
 0x432   : > { %v1456_v38 = vmax.f32 %v1433_v35, 0.0  ;;  %v1895_v39 = vpop.f32.mrb[6].mxu1 }
 0x433   : > { %v1468_v41 = vsel %vm2418_vm9, %v1457_v37, %v1438_v31  ;;  %v1448_v42 = vadd.f32 %v1895_v39, %v1680_v6  ;;  %v1442_v43 = vpop.f32.mrb[7].mxu1 }
 0x434   : > { %1476 = vst.msk [vmem:[#allocation2 + $0x28] sm:$0xff] %vm1029_vm2, %v1468_v41  ;;  %1484 = vst.msk [vmem:[%s2503_s10 + $0x28] sm:$0xff] %vm1029_vm2, %v1468_v41  ;;  %v1467_v44 = vsel %vm2418_vm9, %v1456_v38, %v1433_v35  ;;  %v1443_v45 = vadd.f32 %v1680_v6, %v1442_v43 }
 0x435   : > { %1475 = vst.msk [vmem:[#allocation2 + $0x20] sm:$0xff] %vm1029_vm2, %v1467_v44  ;;  %1483 = vst.msk [vmem:[%s2503_s10 + $0x20] sm:$0xff] %vm1029_vm2, %v1467_v44  ;;  %v1459_v46 = vmax.f32 %v1448_v42, 0.0 }
 0x436   : > { %v1458_v47 = vmax.f32 %v1443_v45, 0.0 }
 0x437   : > { %v1470_v48 = vsel %vm2418_vm9, %v1459_v46, %v1448_v42 }
 0x438   : > { %1478 = vst.msk [vmem:[#allocation2 + $0x38] sm:$0xff] %vm1029_vm2, %v1470_v48  ;;  %1486 = vst.msk [vmem:[%s2503_s10 + $0x38] sm:$0xff] %vm1029_vm2, %v1470_v48  ;;  %v1469_v18 = vsel %vm2418_vm9, %v1458_v47, %v1443_v45 }
 0x439   : > { %1477 = vst.msk [vmem:[#allocation2 + $0x30] sm:$0xff] %vm1029_vm2, %v1469_v18  ;;  %1485 = vst.msk [vmem:[%s2503_s10 + $0x30] sm:$0xff] %vm1029_vm2, %v1469_v18 }
 0x43a PF: > { %s2521_s1 = sld [smem:[#allocation6_spill]]  ;;  %s2522_s13 = sld [smem:[#allocation4_spill]] }
 0x43b   : > { %s2523_s14 = sld [smem:[#allocation5_spill]]  ;;  %s2524_s15 = sld [smem:[#allocation7_spill]] }
 0x43c   : > { %s2525_s16 = sld [smem:[#allocation8_spill]] }
 0x440   : > { %s20_s17 = sadd.s32 1, %s2521_s1  }
 0x441   : > { %p17_p13 = scmp.ge.s32.totalorder %s20_s17, 8  }
 0x443   :  { %19 = sbr.rel (!%p17_p13) target bundleno = 3 (0x3), region = 122 }

</bundles_post_ra>
